<compile_context>
chip_gen: v7x
topology: tpu7x:2x2x1
jax: 0.10.0
libtpu: 0.0.40
codegen_flags: <defaults>
</compile_context>

<pallas_src>
import functools

import jax
import jax.numpy as jnp
import numpy as np
from jax import lax
from jax.experimental import pallas as pl
from jax.experimental.pallas import tpu as pltpu


def _sa_kernel(xj_ref, xi_ref, w_ref, wl_ref, bias_ref, o_ref,
               m_sc, acc_sc, *, mm_dtype, block_b):
    """One (batch-block, J-tile, I-tile) grid step of the flash-style SA layer."""
    i = pl.program_id(2)
    n_i = pl.num_programs(2)

    C = wl_ref.shape[0]
    f32 = jnp.float32
    approx = jnp.dtype(mm_dtype) != jnp.dtype(jnp.float32)

    # ---- init: reset the online-softmax state at the start of every I sweep.
    # Runs at i == 0 of every (b, j), so it stays correct if the parallel grid
    # axes get sharded across TensorCores.
    @pl.when(i == 0)
    def _init():
        m_sc[...] = jnp.full(m_sc.shape, -jnp.inf, f32)
        acc_sc[...] = jnp.zeros(acc_sc.shape, f32)

    w_ext = w_ref[...]            # (2C+1, C+1): [C^-1/2 Wqk^T Wqk ; Wv ; e_ones]

    # ---- one online-softmax step over the I (key) tile, per batch element.
    # lax.fori_loop (not a Python loop) so the (tI, tJ) temporaries of the
    # different batch elements are never live at the same time.
    def step(b, carry):
        xi = xi_ref[b]                                           # (C+1, tI), mm_dtype
        xj = xj_ref[b]                                           # (C,   tJ), x dtype
        # Fused projection: rows 0..C-1 = M @ x, rows C..2C-1 = Wv @ x,
        # row 2C = ones (picked from the constant ones channel of xi).
        proj = jnp.dot(w_ext, xi, preferred_element_type=f32)    # (2C+1, tI)
        yi = proj[0:C, :].astype(mm_dtype)                       # (C,   tI)
        vp = proj[C:2 * C + 1, :].astype(mm_dtype)               # (C+1, tI) = [Wv x ; 1]

        # Energy block s[i', j'] = x_i'^T (C^-1/2 Wqk^T Wqk) x_j'; contraction
        # over the full C channels, transpose folded into dot_general.
        s = lax.dot_general(yi, xj.astype(mm_dtype),
                            (((0,), (0,)), ((), ())),
                            preferred_element_type=f32)          # (tI, tJ)

        m_prev = m_sc[b]                                         # (1, tJ)
        m_new = jnp.maximum(m_prev, jnp.max(s, axis=0, keepdims=True))
        alpha = jnp.exp(m_prev - m_new)                          # (1, tJ)
        p = jnp.exp(s - m_new).astype(mm_dtype)                  # (tI, tJ)
        # Row C of acc_sc is the softmax denominator (via the ones row of vp).
        acc_sc[b] = alpha * acc_sc[b] + jnp.dot(
            vp, p, preferred_element_type=f32)                   # (C+1, tJ)
        m_sc[b] = m_new
        return carry

    lax.fori_loop(0, block_b, step, 0)

    # ---- finalize: normalize, add v bias, offset, LBR (BN folded), residual.
    @pl.when(i == n_i - 1)
    def _fin():
        wl = wl_ref[...]                           # (C, C), BN scale folded in
        bias = bias_ref[...]                       # (C, 2) = [bv | bl']
        bv = bias[:, 0:1]
        bl = bias[:, 1:2]

        def fin(b, carry):
            xj = xj_ref[b].astype(f32)                           # (C, tJ)
            acc = acc_sc[b]                                      # (C+1, tJ)
            inv_l = pl.reciprocal(acc[C:C + 1, :], approx=approx)
            # softmax columns sum to 1  =>  (v + bv) @ attn == v @ attn + bv
            x_r = acc[0:C, :] * inv_l + bv                       # (C, tJ)
            x_r = xj - x_r                                       # offset=True
            lbr = jnp.dot(wl, x_r.astype(mm_dtype),
                          preferred_element_type=f32) + bl
            lbr = jnp.maximum(lbr, 0.0)                          # ReLU (BN folded)
            o_ref[b] = (xj + lbr).astype(o_ref.dtype)
            return carry

        lax.fori_loop(0, block_b, fin, 0)


def sa_layer(x, wqk, wv, bv, wl, bl, bn_scale, bn_shift, *,
             block_b=2, tile_j=512, tile_i=1024, matmul_dtype=jnp.bfloat16):
    """SA_Layer forward.  x: (B, C, N); weights are the raw module params."""
    B, C, N = x.shape
    C4 = C // 4
    assert wqk.shape == (C4, C)
    assert C % 8 == 0 and N % 128 == 0

    block_b = max(1, min(block_b, B))
    assert B % block_b == 0
    tj = min(tile_j, N)
    ti = min(tile_i, N)
    assert N % tj == 0 and N % ti == 0

    f32 = jnp.float32

    # ---- host-side weight folding (O(C^2), done once on parameters) --------
    wqk32 = wqk.astype(f32)
    # Shared q/k conv folded into one symmetric (C, C) matrix:
    #   energy = C^-0.5 * (Wqk x)^T (Wqk x) = x^T M x,  M = C^-0.5 * Wqk^T Wqk.
    m_fold = (C ** (-0.5)) * (wqk32.T @ wqk32)                  # (C, C)
    wl_f = (bn_scale * wl).astype(f32)                          # BN scale into conv W
    bl_f = (bn_scale * bl + bn_shift).astype(f32)               # BN shift into conv b

    # Stacked weight over an input with an appended constant ones channel:
    #   rows 0..C-1 : [M  | 0]   -> M @ x
    #   rows C..2C-1: [Wv | 0]   -> Wv @ x
    #   row  2C     : [0  | 1]   -> ones row (softmax denominator via MXU)
    w_ext = jnp.zeros((2 * C + 1, C + 1), f32)
    w_ext = w_ext.at[0:C, 0:C].set(m_fold)
    w_ext = w_ext.at[C:2 * C, 0:C].set(wv.astype(f32))
    w_ext = w_ext.at[2 * C, C].set(1.0)
    w_ext = w_ext.astype(matmul_dtype)                          # (2C+1, C+1)
    wl_mm = wl_f.astype(matmul_dtype)                           # (C, C)
    bias = jnp.concatenate([bv.reshape(C, 1), bl_f.reshape(C, 1)],
                           axis=1).astype(f32)                  # (C, 2)

    # I-view of x: pre-cast to the matmul dtype (it is the only block that is
    # re-fetched on every inner grid step) and extended with the ones channel.
    x_i = jnp.concatenate([x, jnp.ones((B, 1, N), x.dtype)],
                          axis=1).astype(matmul_dtype)          # (B, C+1, N)

    grid = (B // block_b, N // tj, N // ti)

    # ---- explicit VMEM budget: double-buffered tiles, weights, scratch and
    # the materialized (tI, tJ) softmax temporaries (one live batch element
    # thanks to the fori_loop over b).  Capped below v7x's 64 MiB VMEM.
    io_b = jnp.dtype(x.dtype).itemsize
    mm_b = jnp.dtype(matmul_dtype).itemsize
    w_bytes = ((2 * C + 1) * (C + 1) + C * C) * mm_b + C * 2 * 4
    est = (2 * block_b * C * tj * io_b            # xj view, double-buffered
           + 2 * block_b * (C + 8) * ti * mm_b    # xi view (ones channel, padded)
           + 2 * block_b * C * tj * io_b          # output, double-buffered
           + 2 * w_bytes                          # weights + biases
           + block_b * (C + 10) * tj * 4          # m / [acc ; l] scratch (padded)
           + 3 * ti * tj * 4 + ti * tj * mm_b)    # s, exp, p temporaries
    vmem_limit = int(min(64 * 2 ** 20, max(32 * 2 ** 20, 2 * est)))

    kernel = functools.partial(_sa_kernel, mm_dtype=matmul_dtype,
                               block_b=block_b)
    return pl.pallas_call(
        kernel,
        out_shape=jax.ShapeDtypeStruct((B, C, N), x.dtype),
        grid_spec=pltpu.PrefetchScalarGridSpec(
            num_scalar_prefetch=0,
            grid=grid,
            in_specs=[
                pl.BlockSpec((block_b, C, tj), lambda b, j, i: (b, 0, j)),      # x, J view
                pl.BlockSpec((block_b, C + 1, ti), lambda b, j, i: (b, 0, i)),  # x+ones, I view
                pl.BlockSpec((2 * C + 1, C + 1), lambda b, j, i: (0, 0)),       # [M; Wv; e]
                pl.BlockSpec((C, C), lambda b, j, i: (0, 0)),                   # LBR W (BN folded)
                pl.BlockSpec((C, 2), lambda b, j, i: (0, 0)),                   # [bv | bl']
            ],
            out_specs=pl.BlockSpec((block_b, C, tj), lambda b, j, i: (b, 0, j)),
            scratch_shapes=[
                pltpu.VMEM((block_b, 1, tj), jnp.float32),       # running max
                pltpu.VMEM((block_b, C + 1, tj), jnp.float32),   # [acc ; l] accumulator
            ]),
        compiler_params=pltpu.CompilerParams(
            dimension_semantics=("parallel", "parallel", "arbitrary"),
            vmem_limit_bytes=vmem_limit),
    )(x, x_i, w_ext, wl_mm, bias)


def reference(x, wqk, wv, bv, wl, bl, bn_scale, bn_shift):
    """Pure-JAX reference mirroring the PyTorch forward (normal_type='SL')."""
    C = x.shape[1]
    qk = jnp.einsum('oc,bcn->bon', wqk, x)                   # q_conv == k_conv
    x_q = jnp.transpose(qk, (0, 2, 1))                       # (B, N, C//4)
    x_k = qk                                                 # (B, C//4, N)
    x_v = jnp.einsum('oc,bcn->bon', wv, x) + bv[None]        # (B, C, N)
    energy = jnp.einsum('bnc,bcm->bnm', x_q, x_k)            # (B, N, N)
    energy = energy * (C ** (-0.5))
    attention = jax.nn.softmax(energy, axis=-2)
    x_r = jnp.einsum('bcn,bnm->bcm', x_v, attention)
    x_r = x - x_r                                            # offset=True
    lbr = jnp.einsum('oc,bcn->bon', wl, x_r) + bl[None]
    lbr = jnp.maximum(lbr * bn_scale[None] + bn_shift[None], 0.0)
    return x + lbr


if __name__ == "__main__":
    B, C, N = 4, 32, 256       # small shapes; exercises multi-tile online softmax
    C4 = C // 4
    key = jax.random.PRNGKey(0)
    kx, kqk, kv, kbv, kl, kbl = jax.random.split(key, 6)

    x = jax.random.normal(kx, (B, C, N), dtype=jnp.float32)

    # Conv1d kernel-size-1 weights as (out, in).
    wqk = 0.1 * jax.random.normal(kqk, (C4, C), dtype=jnp.float32)  # shared q/k
    wv = 0.1 * jax.random.normal(kv, (C, C), dtype=jnp.float32)
    bv = 0.1 * jax.random.normal(kbv, (C, 1), dtype=jnp.float32)
    wl = 0.1 * jax.random.normal(kl, (C, C), dtype=jnp.float32)
    bl = 0.1 * jax.random.normal(kbl, (C, 1), dtype=jnp.float32)

    # BN1d in eval mode at init: gamma=1, beta=0, mean=0, var=1, eps=1e-5.
    eps = 1e-5
    gamma = jnp.ones((C, 1), jnp.float32)
    beta = jnp.zeros((C, 1), jnp.float32)
    running_mean = jnp.zeros((C, 1), jnp.float32)
    running_var = jnp.ones((C, 1), jnp.float32)
    bn_scale = gamma / jnp.sqrt(running_var + eps)
    bn_shift = beta - running_mean * bn_scale
    # TODO(synk): training-mode BN (batch statistics) is not modeled; eval-mode stats are used.

    ref = reference(x, wqk, wv, bv, wl, bl, bn_scale, bn_shift)

    # f32 path with small tiles: exact module semantics, exercises the
    # multi-step online-softmax path (N // tile_i = 2 inner steps).
    out_f32 = sa_layer(x, wqk, wv, bv, wl, bl, bn_scale, bn_shift,
                       block_b=2, tile_j=128, tile_i=128,
                       matmul_dtype=jnp.float32)
    out_f32 = jax.block_until_ready(out_f32)
    np.testing.assert_allclose(np.asarray(out_f32), np.asarray(ref),
                               rtol=2e-4, atol=2e-4)

    # Default production path: bf16 MXU operands, f32 accumulation, full tiles.
    out_bf16 = sa_layer(x, wqk, wv, bv, wl, bl, bn_scale, bn_shift)
    out_bf16 = jax.block_until_ready(out_bf16)
    np.testing.assert_allclose(np.asarray(out_bf16), np.asarray(ref),
                               rtol=5e-2, atol=5e-2)

    print("KERNEL_OK")
</pallas_src>

<mosaic_0001>
module attributes {stable_mosaic.version = 11 : i64} {
  func.func @_sa_kernel(%arg0: i32, %arg1: i32, %arg2: i32, %arg3: memref<2x32x128xf32, #tpu.memory_space<vmem>>, %arg4: memref<2x33x128xf32, #tpu.memory_space<vmem>>, %arg5: memref<65x33xf32, #tpu.memory_space<vmem>>, %arg6: memref<32x32xf32, #tpu.memory_space<vmem>>, %arg7: memref<32x2xf32, #tpu.memory_space<vmem>>, %arg8: memref<2x32x128xf32, #tpu.memory_space<vmem>>, %arg9: memref<2x1x128xf32, #tpu.memory_space<vmem>>, %arg10: memref<2x33x128xf32, #tpu.memory_space<vmem>>) attributes {dimension_semantics = [#tpu.dimension_semantics<parallel>, #tpu.dimension_semantics<parallel>, #tpu.dimension_semantics<arbitrary>], iteration_bounds = array<i64: 2, 2, 2>, scalar_prefetch = 0 : i64, scratch_operands = 2 : i64, tpu.core_type = #tpu.core_type<tc>, window_params = [{transform_indices = @transform_0, window_bounds = array<i64: 2, 32, 128>}, {transform_indices = @transform_1, window_bounds = array<i64: 2, 33, 128>}, {pipeline_mode = #tpu.pipeline_mode<synchronous>, transform_indices = @transform_2, window_bounds = array<i64: 65, 33>}, {pipeline_mode = #tpu.pipeline_mode<synchronous>, transform_indices = @transform_3, window_bounds = array<i64: 32, 32>}, {pipeline_mode = #tpu.pipeline_mode<synchronous>, transform_indices = @transform_4, window_bounds = array<i64: 32, 2>}, {transform_indices = @transform_5, window_bounds = array<i64: 2, 32, 128>}]} {
    %c0_i32 = arith.constant 0 : i32
    %0 = arith.cmpi eq, %arg2, %c0_i32 : i32
    %1 = arith.extui %0 : i1 to i32
    %c0_i32_0 = arith.constant 0 : i32
    %2 = arith.cmpi ne, %1, %c0_i32_0 : i32
    scf.if %2 {
      %cst = arith.constant 0xFF800000 : f32
      %8 = vector.broadcast %cst : f32 to vector<2x1x128xf32>
      %c0_6 = arith.constant 0 : index
      %c0_7 = arith.constant 0 : index
      %c0_8 = arith.constant 0 : index
      %9 = vector.load %arg9[%c0_6, %c0_7, %c0_8] : memref<2x1x128xf32, #tpu.memory_space<vmem>>, vector<2x1x128xf32>
      tpu.vector_store %arg9[%c0_6, %c0_7, %c0_8], %8 {strides = array<i32>} : memref<2x1x128xf32, #tpu.memory_space<vmem>>, vector<2x1x128xf32>,
      %cst_9 = arith.constant 0.000000e+00 : f32
      %10 = vector.broadcast %cst_9 : f32 to vector<2x33x128xf32>
      %c0_10 = arith.constant 0 : index
      %c0_11 = arith.constant 0 : index
      %c0_12 = arith.constant 0 : index
      %11 = vector.load %arg10[%c0_10, %c0_11, %c0_12] : memref<2x33x128xf32, #tpu.memory_space<vmem>>, vector<2x33x128xf32>
      tpu.vector_store %arg10[%c0_10, %c0_11, %c0_12], %10 {strides = array<i32>} : memref<2x33x128xf32, #tpu.memory_space<vmem>>, vector<2x33x128xf32>,
    } else {
    }
    %c0 = arith.constant 0 : index
    %c0_1 = arith.constant 0 : index
    %3 = vector.load %arg5[%c0, %c0_1] : memref<65x33xf32, #tpu.memory_space<vmem>>, vector<65x33xf32>
    %c0_i32_2 = arith.constant 0 : i32
    %c2_i32 = arith.constant 2 : i32
    %4 = arith.addi %c0_i32_2, %c2_i32 : i32
    %c1_i32 = arith.constant 1 : i32
    scf.for %arg11 = %c0_i32_2 to %4 step %c1_i32  : i32 {
      %8 = arith.index_cast %arg11 : i32 to index
      %c0_6 = arith.constant 0 : index
      %c0_7 = arith.constant 0 : index
      %9 = vector.load %arg4[%8, %c0_6, %c0_7] : memref<2x33x128xf32, #tpu.memory_space<vmem>>, vector<1x33x128xf32>
      %10 = vector.shape_cast %9 : vector<1x33x128xf32> to vector<33x128xf32>
      %11 = arith.index_cast %arg11 : i32 to index
      %c0_8 = arith.constant 0 : index
      %c0_9 = arith.constant 0 : index
      %12 = vector.load %arg3[%11, %c0_8, %c0_9] : memref<2x32x128xf32, #tpu.memory_space<vmem>>, vector<1x32x128xf32>
      %13 = vector.shape_cast %12 : vector<1x32x128xf32> to vector<32x128xf32>
      %cst = arith.constant dense<0.000000e+00> : vector<65x128xf32>
      %14 = tpu.matmul %3, %10, %cst {dimension_numbers = #tpu.dot_dimension_numbers<[1], [0], [0], [1], [0, 0, 1, 1], [], []>} : vector<65x33xf32>, vector<33x128xf32>, vector<65x128xf32> -> vector<65x128xf32>
      %15 = vector.extract_strided_slice %14 {offsets = [0, 0], sizes = [32, 128], strides = [1, 1]} : vector<65x128xf32> to vector<32x128xf32>
      %16 = vector.extract_strided_slice %14 {offsets = [32, 0], sizes = [33, 128], strides = [1, 1]} : vector<65x128xf32> to vector<33x128xf32>
      %cst_10 = arith.constant dense<0.000000e+00> : vector<128x128xf32>
      %17 = tpu.matmul %15, %13, %cst_10 {dimension_numbers = #tpu.dot_dimension_numbers<[0], [0], [1], [1], [0, 1, 1, 1], [], []>} : vector<32x128xf32>, vector<32x128xf32>, vector<128x128xf32> -> vector<128x128xf32>
      %18 = arith.index_cast %arg11 : i32 to index
      %c0_11 = arith.constant 0 : index
      %c0_12 = arith.constant 0 : index
      %19 = vector.load %arg9[%18, %c0_11, %c0_12] : memref<2x1x128xf32, #tpu.memory_space<vmem>>, vector<1x1x128xf32>
      %20 = vector.shape_cast %19 : vector<1x1x128xf32> to vector<1x128xf32>
      %cst_13 = arith.constant dense<0xFF800000> : vector<128xf32>
      %21 = vector.multi_reduction <maximumf>, %17, %cst_13 [0] : vector<128x128xf32> to vector<128xf32>
      %22 = vector.shape_cast %21 : vector<128xf32> to vector<1x128xf32>
      %23 = arith.maximumf %20, %22 : vector<1x128xf32>
      %24 = arith.subf %20, %23 : vector<1x128xf32>
      %25 = math.exp %24 : vector<1x128xf32>
      %26 = vector.broadcast %23 : vector<1x128xf32> to vector<128x128xf32>
      %27 = arith.subf %17, %26 : vector<128x128xf32>
      %28 = math.exp %27 : vector<128x128xf32>
      %29 = arith.index_cast %arg11 : i32 to index
      %c0_14 = arith.constant 0 : index
      %c0_15 = arith.constant 0 : index
      %30 = vector.load %arg10[%29, %c0_14, %c0_15] : memref<2x33x128xf32, #tpu.memory_space<vmem>>, vector<1x33x128xf32>
      %31 = vector.shape_cast %30 : vector<1x33x128xf32> to vector<33x128xf32>
      %32 = vector.broadcast %25 : vector<1x128xf32> to vector<33x128xf32>
      %33 = arith.mulf %32, %31 : vector<33x128xf32>
      %cst_16 = arith.constant dense<0.000000e+00> : vector<33x128xf32>
      %34 = tpu.matmul %16, %28, %cst_16 {dimension_numbers = #tpu.dot_dimension_numbers<[1], [0], [0], [1], [0, 0, 1, 1], [], []>} : vector<33x128xf32>, vector<128x128xf32>, vector<33x128xf32> -> vector<33x128xf32>
      %35 = arith.addf %33, %34 : vector<33x128xf32>
      %36 = arith.index_cast %arg11 : i32 to index
      %c0_17 = arith.constant 0 : index
      %c0_18 = arith.constant 0 : index
      %37 = vector.load %arg10[%36, %c0_17, %c0_18] : memref<2x33x128xf32, #tpu.memory_space<vmem>>, vector<1x33x128xf32>
      %38 = vector.shape_cast %37 : vector<1x33x128xf32> to vector<33x128xf32>
      %39 = vector.shape_cast %35 : vector<33x128xf32> to vector<1x33x128xf32>
      tpu.vector_store %arg10[%36, %c0_17, %c0_18], %39 {strides = array<i32>} : memref<2x33x128xf32, #tpu.memory_space<vmem>>, vector<1x33x128xf32>,
      %40 = arith.index_cast %arg11 : i32 to index
      %c0_19 = arith.constant 0 : index
      %c0_20 = arith.constant 0 : index
      %41 = vector.load %arg9[%40, %c0_19, %c0_20] : memref<2x1x128xf32, #tpu.memory_space<vmem>>, vector<1x1x128xf32>
      %42 = vector.shape_cast %41 : vector<1x1x128xf32> to vector<1x128xf32>
      %43 = vector.shape_cast %23 : vector<1x128xf32> to vector<1x1x128xf32>
      tpu.vector_store %arg9[%40, %c0_19, %c0_20], %43 {strides = array<i32>} : memref<2x1x128xf32, #tpu.memory_space<vmem>>, vector<1x1x128xf32>,
    }
    %c2_i32_3 = arith.constant 2 : i32
    %c1_i32_4 = arith.constant 1 : i32
    %5 = arith.cmpi eq, %arg2, %c1_i32_4 : i32
    %6 = arith.extui %5 : i1 to i32
    %c0_i32_5 = arith.constant 0 : i32
    %7 = arith.cmpi ne, %6, %c0_i32_5 : i32
    scf.if %7 {
      %c0_6 = arith.constant 0 : index
      %c0_7 = arith.constant 0 : index
      %8 = vector.load %arg6[%c0_6, %c0_7] : memref<32x32xf32, #tpu.memory_space<vmem>>, vector<32x32xf32>
      %c0_8 = arith.constant 0 : index
      %c0_9 = arith.constant 0 : index
      %9 = vector.load %arg7[%c0_8, %c0_9] : memref<32x2xf32, #tpu.memory_space<vmem>>, vector<32x2xf32>
      %10 = vector.extract_strided_slice %9 {offsets = [0, 0], sizes = [32, 1], strides = [1, 1]} : vector<32x2xf32> to vector<32x1xf32>
      %11 = vector.extract_strided_slice %9 {offsets = [0, 1], sizes = [32, 1], strides = [1, 1]} : vector<32x2xf32> to vector<32x1xf32>
      %c0_i32_10 = arith.constant 0 : i32
      %c2_i32_11 = arith.constant 2 : i32
      %12 = arith.addi %c0_i32_10, %c2_i32_11 : i32
      %c1_i32_12 = arith.constant 1 : i32
      scf.for %arg11 = %c0_i32_10 to %12 step %c1_i32_12  : i32 {
        %13 = arith.index_cast %arg11 : i32 to index
        %c0_14 = arith.constant 0 : index
        %c0_15 = arith.constant 0 : index
        %14 = vector.load %arg3[%13, %c0_14, %c0_15] : memref<2x32x128xf32, #tpu.memory_space<vmem>>, vector<1x32x128xf32>
        %15 = vector.shape_cast %14 : vector<1x32x128xf32> to vector<32x128xf32>
        %16 = arith.index_cast %arg11 : i32 to index
        %c0_16 = arith.constant 0 : index
        %c0_17 = arith.constant 0 : index
        %17 = vector.load %arg10[%16, %c0_16, %c0_17] : memref<2x33x128xf32, #tpu.memory_space<vmem>>, vector<1x33x128xf32>
        %18 = vector.shape_cast %17 : vector<1x33x128xf32> to vector<33x128xf32>
        %19 = vector.extract_strided_slice %18 {offsets = [32, 0], sizes = [1, 128], strides = [1, 1]} : vector<33x128xf32> to vector<1x128xf32>
        %20 = tpu.reciprocal %19 : vector<1x128xf32> -> vector<1x128xf32>
        %21 = vector.extract_strided_slice %18 {offsets = [0, 0], sizes = [32, 128], strides = [1, 1]} : vector<33x128xf32> to vector<32x128xf32>
        %22 = vector.broadcast %20 : vector<1x128xf32> to vector<32x128xf32>
        %23 = arith.mulf %21, %22 : vector<32x128xf32>
        %24 = vector.broadcast %10 : vector<32x1xf32> to vector<32x128xf32>
        %25 = arith.addf %23, %24 : vector<32x128xf32>
        %26 = arith.subf %15, %25 : vector<32x128xf32>
        %cst = arith.constant dense<0.000000e+00> : vector<32x128xf32>
        %27 = tpu.matmul %8, %26, %cst {dimension_numbers = #tpu.dot_dimension_numbers<[1], [0], [0], [1], [0, 0, 1, 1], [], []>} : vector<32x32xf32>, vector<32x128xf32>, vector<32x128xf32> -> vector<32x128xf32>
        %28 = vector.broadcast %11 : vector<32x1xf32> to vector<32x128xf32>
        %29 = arith.addf %27, %28 : vector<32x128xf32>
        %cst_18 = arith.constant 0.000000e+00 : f32
        %30 = vector.broadcast %cst_18 : f32 to vector<32x128xf32>
        %31 = arith.maximumf %29, %30 : vector<32x128xf32>
        %32 = arith.addf %15, %31 : vector<32x128xf32>
        %33 = arith.index_cast %arg11 : i32 to index
        %c0_19 = arith.constant 0 : index
        %c0_20 = arith.constant 0 : index
        %34 = vector.load %arg8[%33, %c0_19, %c0_20] : memref<2x32x128xf32, #tpu.memory_space<vmem>>, vector<1x32x128xf32>
        %35 = vector.shape_cast %34 : vector<1x32x128xf32> to vector<32x128xf32>
        %36 = vector.shape_cast %32 : vector<32x128xf32> to vector<1x32x128xf32>
        tpu.vector_store %arg8[%33, %c0_19, %c0_20], %36 {strides = array<i32>} : memref<2x32x128xf32, #tpu.memory_space<vmem>>, vector<1x32x128xf32>,
      }
      %c2_i32_13 = arith.constant 2 : i32
    } else {
    }
    return
  }
  func.func @transform_0(%arg0: i32, %arg1: i32, %arg2: i32) -> (i32, i32, i32) {
    %c0_i32 = arith.constant 0 : i32
    %c0_i32_0 = arith.constant 0 : i32
    return %arg0, %c0_i32, %arg1 : i32, i32, i32
  }
  func.func @transform_1(%arg0: i32, %arg1: i32, %arg2: i32) -> (i32, i32, i32) {
    %c0_i32 = arith.constant 0 : i32
    %c0_i32_0 = arith.constant 0 : i32
    return %arg0, %c0_i32, %arg2 : i32, i32, i32
  }
  func.func @transform_2(%arg0: i32, %arg1: i32, %arg2: i32) -> (i32, i32) {
    %c0_i32 = arith.constant 0 : i32
    %c0_i32_0 = arith.constant 0 : i32
    %c0_i32_1 = arith.constant 0 : i32
    return %c0_i32, %c0_i32_0 : i32, i32
  }
  func.func @transform_3(%arg0: i32, %arg1: i32, %arg2: i32) -> (i32, i32) {
    %c0_i32 = arith.constant 0 : i32
    %c0_i32_0 = arith.constant 0 : i32
    %c0_i32_1 = arith.constant 0 : i32
    return %c0_i32, %c0_i32_0 : i32, i32
  }
  func.func @transform_4(%arg0: i32, %arg1: i32, %arg2: i32) -> (i32, i32) {
    %c0_i32 = arith.constant 0 : i32
    %c0_i32_0 = arith.constant 0 : i32
    %c0_i32_1 = arith.constant 0 : i32
    return %c0_i32, %c0_i32_0 : i32, i32
  }
  func.func @transform_5(%arg0: i32, %arg1: i32, %arg2: i32) -> (i32, i32, i32) {
    %c0_i32 = arith.constant 0 : i32
    %c0_i32_0 = arith.constant 0 : i32
    return %arg0, %c0_i32, %arg1 : i32, i32, i32
  }
}

</mosaic_0001>

<bundles_post_ra>
// kernel: tpu_custom_call.1
= control target key start
LH: loop header
LB: loop body
LE: loop exit
PB: predicated region body
PF: predicated region fallthrough
CT: control target
= control target key end

     0   :  { %s2566_s0 = inlined_call_operand.vmem [shape: f32[4,32,256], index: 0, kind: input, shape index: {}]   ;;  %s2567_s1 = inlined_call_operand.vmem [shape: f32[4,33,256], index: 1, kind: input, shape index: {}]   ;;  %s2568_s2 = inlined_call_operand.vmem [shape: f32[65,33], index: 2, kind: input, shape index: {}]   ;;  %s2569_s3 = inlined_call_operand.vmem [shape: f32[32,32], index: 3, kind: input, shape index: {}]   ;;  %s2570_s4 = inlined_call_operand.vmem [shape: f32[32,2], index: 4, kind: input, shape index: {}]   ;;  %s2571_s5 = inlined_call_operand.hbm [shape: f32[4,32,256], index: 5, kind: output, shape index: {}]  }
   0x1   :  { %2579 = sst [smem:[#allocation14_spill]] %s2571_s5 }
   0x2   :  { %10 = vsyncpa [#allocation7], 0 }
   0x3   :  { %12 = vsyncpa [#allocation7 + $0x1], 0  ;;  %s2035_s18 = smov 0   ;;  %s2037_s19 = smov 0  }
   0x4   :  { %s2039_s20 = smov 0   ;;  %s2041_s21 = smov 0  }
   0x5   :  { %s2043_s22 = smov 0   ;;  %s2045_s23 = smov 0  }
   0x6   :  { %s2047_s24 = smov 0   ;;  %s2049_s25 = smov 0  }
   0x7   :  { %s2051_s26 = smov 0   ;;  %s2053_s27 = smov 0  }
   0x8   :  { %s2055_s28 = smov 0   ;;  %s2057_s29 = smov 0  }
   0x9 LB: > { %2580 = sst [smem:[#allocation9_spill]] %s1940_s18  ;;  %s1363_s30 = sadd.s32 4294967295, %s1984_s29   ;;  %s1984_s29 = sphi %s2057_s29, %s18_s29   ;;  %s1980_s28 = sphi %s2055_s28, %s2610_s28   ;;  %s1976_s27 = sphi %s2053_s27, %s2609_s27   ;;  %s1972_s26 = sphi %s2051_s26, %s2608_s26   ;;  %s1968_s25 = sphi %s2049_s25, %s2607_s25   ;;  %s1964_s24 = sphi %s2047_s24, %s2606_s24   ;;  %s1960_s23 = sphi %s2045_s23, %s2605_s23   ;;  %s1956_s22 = sphi %s2043_s22, %s2604_s22   ;;  %s1952_s21 = sphi %s2041_s21, %s2603_s21   ;;  %s1948_s20 = sphi %s2039_s20, %s2602_s20   ;;  %s1944_s19 = sphi %s2037_s19, %s2601_s19   ;;  %s1940_s18 = sphi %s2035_s18, %s2600_s18  }
   0xa   : > { %s1364_s6 = sadd.s32 4294967294, %s1984_s29   ;;  %s30_s7 = sadd.s32 1, %s1972_s26 }
   0xb   : > { %p31_p0 = scmp.ge.s32.totalorder %s30_s7, 2  ;;  %s33_s8 = sadd.s32 1, %s1976_s27 }
   0xc   : > { %s37_s9 = sadd.s32 1, %s1980_s28  ;;  %p53_p1 = scmp.ne.s32.totalorder %s1956_s22, %s1952_s21 }
   0xd   : > { %s2612_s7 = smov (%p31_p0, %s30_s7), 0  ;;  %s2614_s8 = smov (!%p31_p0, %s33_s8), %s1976_s27 }
   0xe   : > { %2581 = sst [smem:[#allocation10_spill]] %s2612_s7  ;;  %s46_s10 = sadd.s32 1, %s1956_s22 }
   0xf   : > { %p54_p2 = scmp.eq.s32.totalorder %s1984_s29, 0  ;;  %p35_p3 = scmp.ge.s32.totalorder %s2614_s8, 2 }
  0x10   : > { %s70_s11 = ssub.s32 %s1972_s26, %s2612_s7  ;;  %p81_p5 = scmp.ne.s32.totalorder %s1948_s20, %s1944_s19 }
  0x11   : > { %p2112_p4 = por %p54_p2, %p53_p1  ;;  %s2616_s8 = smov (%p35_p3, %s2614_s8), 0 }
  0x12   : > { %2583 = sst [smem:[#allocation11_spill]] %s2616_s8  ;;  %s2618_s9 = smov (!%p35_p3, %s37_s9), %s1980_s28 }
  0x13   : > { %s42_s13 = ssub.s32 %s1976_s27, %s2616_s8  ;;  %p2123_p6 = por %p81_p5, %p54_p2 }
  0x14   : > { %p39_p7 = scmp.ge.s32.totalorder %s2618_s9, 2  ;;  %p176_p8 = scmp.eq.s32.totalorder %s1363_s30, 7 }
  0x15   : > { %p181_p9 = scmp.ne.s32.totalorder %s1952_s21, %s1940_s18  ;;  %p182_p10 = scmp.eq.s32.totalorder %s1364_s6, 7 }
  0x16   : > { %s2620_s9 = smov (%p39_p7, %s2618_s9), 0  ;;  %p2134_p11 = por %p176_p8, %p53_p1 }
  0x17   : > { %2585 = sst [smem:[#allocation12_spill]] %s2620_s9  ;;  %p2138_p12 = por %p182_p10, %p181_p9 }
  0x18   : > { %s41_s17 = ssub.s32 %s1980_s28, %s2620_s9  ;;  %s74_s8 = sadd.s32 1, %s1948_s20 }
  0x19   : > { %s2587_s16 = scalar_select %p2138_p12, 1, 0 }
  0x1a   : > { %s43_s7 = sor.u32 %s42_s13, %s41_s17  ;;  %s71_s5 = sor.u32 %s70_s11, %s41_s17 }
  0x1b   : > { %2588 = sst [smem:[#allocation13_spill]] %s2587_s16  ;;  %p44_p13 = scmp.eq.s32.totalorder %s43_s7, 0 }
  0x1c   : > { %p72_p0 = scmp.eq.s32.totalorder %s71_s5, 0  ;;  %p1366_p2 = scmp.ge.s32.totalorder %s1984_s29, 8 }
  0x1d   : > { %s2146_s30 = scalar_select %p44_p13, %s1956_s22, %s46_s10  }
  0x1e   : > { %s2149_s6 = scalar_select %p72_p0, %s1948_s20, %s74_s8  }
  0x1f   : > { %207 = sbr.rel (%p1366_p2) target bundleno = 60 (0x3c), region = 28 }
  0x26   : > { %210 = sbr.rel (!%p2112_p4) target bundleno = 48 (0x30), region = 32  ;;  %s212_s16 = sand.u32 (%p2112_p4), 1, %s1956_s22  }
  0x27   : > { %s1417_s9 = sshll.u32 (%p2112_p4), %s1980_s28, 4  ;;  %s1367_s18 = sshll.u32 (%p2112_p4), %s212_s16, 6 }
  0x28   : > { %s217_s13 = sadd.s32 (%p2112_p4), %s1976_s27, %s1417_s9  ;;  %s214_s8 = scalar_lea.vmem (%p2112_p4), [#allocation4], %s1367_s18 }
  0x29   : > { %s1370_s11 = sshll.u32 (%p2112_p4), %s217_s13, 3 }
  0x2a   : > { %s219_s10 = scalar_lea.vmem (%p2112_p4), %s2566_s0, %s1370_s11 }
  0x2b   : > { %v261_v0 = vld [vmem:[%s219_s10] sm:$0xff] (%p2112_p4)  ;;  %v263_v1 = vld [vmem:[%s219_s10 + $0x10] sm:$0xff] (%p2112_p4) }
  0x2c   : > { %v265_v2 = vld [vmem:[%s219_s10 + $0x20] sm:$0xff] (%p2112_p4)  ;;  %262 = vst [vmem:[%s214_s8] sm:$0xff] (%p2112_p4), %v261_v0  ;;  %264 = vst [vmem:[%s214_s8 + $0x8] sm:$0xff] (%p2112_p4), %v263_v1  ;;  %v267_v3 = vld [vmem:[%s219_s10 + $0x30] sm:$0xff] (%p2112_p4) }
  0x2d   : > { %266 = vst [vmem:[%s214_s8 + $0x10] sm:$0xff] %v265_v2  ;;  %v269_v4 = vld [vmem:[%s219_s10 + $0x40] sm:$0xff]  ;;  %v271_v5 = vld [vmem:[%s219_s10 + $0x50] sm:$0xff]  ;;  %268 = vst [vmem:[%s214_s8 + $0x18] sm:$0xff] %v267_v3 }
  0x2e   : > { %270 = vst [vmem:[%s214_s8 + $0x20] sm:$0xff] %v269_v4  ;;  %272 = vst [vmem:[%s214_s8 + $0x28] sm:$0xff] %v271_v5  ;;  %v273_v6 = vld [vmem:[%s219_s10 + $0x60] sm:$0xff]  ;;  %v275_v7 = vld [vmem:[%s219_s10 + $0x70] sm:$0xff] }
  0x2f   : > { %274 = vst [vmem:[%s214_s8 + $0x30] sm:$0xff] %v273_v6  ;;  %276 = vst [vmem:[%s214_s8 + $0x38] sm:$0xff] %v275_v7 }
  0x30 PF: > { %282 = sbr.rel (!%p2123_p6) target bundleno = 60 (0x3c), region = 70  ;;  %s284_s18 = sand.u32 (%p2123_p6), 1, %s1948_s20  }
  0x31   : > { %s1679_s9 = smul.u32 (%p2123_p6), 20, %s1980_s28 }
  0x32   : > { %s1678_s12 = smul.u32 (%p2123_p6), 80, %s284_s18 }
  0x33   : > { %s289_s16 = sadd.s32 (%p2123_p6), %s1972_s26, %s1679_s9 }
  0x34   : > { %s1373_s17 = sshll.u32 (%p2123_p6), %s289_s16, 3  ;;  %s286_s5 = scalar_lea.vmem (%p2123_p6), [#allocation5], %s1678_s12 }
  0x35   : > { %s291_s7 = scalar_lea.vmem (%p2123_p6), %s2567_s1, %s1373_s17 }
  0x36   : > { %v337_v8 = vld [vmem:[%s291_s7] sm:$0xff] (%p2123_p6)  ;;  %v339_v9 = vld [vmem:[%s291_s7 + $0x10] sm:$0xff] (%p2123_p6) }
  0x37   : > { %v341_v10 = vld [vmem:[%s291_s7 + $0x20] sm:$0xff]  ;;  %338 = vst [vmem:[%s286_s5] sm:$0xff] %v337_v8  ;;  %340 = vst [vmem:[%s286_s5 + $0x8] sm:$0xff] %v339_v9  ;;  %v343_v11 = vld [vmem:[%s291_s7 + $0x30] sm:$0xff] }
  0x38   : > { %342 = vst [vmem:[%s286_s5 + $0x10] sm:$0xff] %v341_v10  ;;  %v345_v12 = vld [vmem:[%s291_s7 + $0x40] sm:$0xff]  ;;  %v347_v13 = vld [vmem:[%s291_s7 + $0x50] sm:$0xff]  ;;  %344 = vst [vmem:[%s286_s5 + $0x18] sm:$0xff] %v343_v11 }
  0x39   : > { %346 = vst [vmem:[%s286_s5 + $0x20] sm:$0xff] %v345_v12  ;;  %348 = vst [vmem:[%s286_s5 + $0x28] sm:$0xff] %v347_v13  ;;  %v349_v14 = vld [vmem:[%s291_s7 + $0x60] sm:$0xff]  ;;  %v351_v15 = vld [vmem:[%s291_s7 + $0x70] sm:$0xff] }
  0x3a   : > { %v353_v16 = vld [vmem:[%s291_s7 + $0x80] sm:$0xff]  ;;  %350 = vst [vmem:[%s286_s5 + $0x30] sm:$0xff] %v349_v14  ;;  %352 = vst [vmem:[%s286_s5 + $0x38] sm:$0xff] %v351_v15  ;;  %v355_v17 = vld [vmem:[%s291_s7 + $0x90] sm:$0xff] }
  0x3b   : > { %354 = vst [vmem:[%s286_s5 + $0x40] sm:$0xff] %v353_v16  ;;  %356 = vst [vmem:[%s286_s5 + $0x48] sm:$0xff] %v355_v17 }
  0x3c PF: > { %p1374_p1 = scmp.ge.s32.totalorder %s1984_s29, 1  ;;  %p361_p3 = scmp.lt.s32.totalorder %s1984_s29, 9 }
  0x3e   : > { %p362_p4 = pnand %p1374_p1, %p361_p3 }
  0x3f   : > { %s2578_s14 = sand.u32 (!%p362_p4), 1, %s1952_s21   ;;  %s375_s10 = sand.u32 (!%p362_p4), 1, %s1944_s19  }
  0x40   : > { %365 = sbr.rel (%p362_p4) target bundleno = 1414 (0x586), region = 108  ;;  %s2174_s8 = sshll.u32 (!%p362_p4), %s2578_s14, 6 }
  0x41   : > { %s2176_s18 = smul.u32 (!%p362_p4), 80, %s375_s10  ;;  %p1377_p5 = scmp.ne.s32.totalorder (!%p362_p4), %s1960_s23, 0 }
  0x43   : > { %s377_s12 = scalar_lea.vmem (!%p362_p4), [#allocation5], %s2176_s18 }
  0x47   : > { %412 = sbr.rel (%p1377_p5) target bundleno = 78 (0x4e), region = 120  ;;  %v1994_v18 = vmov (!%p1377_p5), -inf   ;;  %v1995_v19 = vmov (!%p1377_p5), 0.0  }
  0x48   : > { %413 = vst [vmem:[#allocation2] sm:$0x1] (!%p1377_p5), %v1994_v18  ;;  %414 = vst [vmem:[#allocation2 + $0x1] sm:$0x1] (!%p1377_p5), %v1994_v18 }
  0x49   : > { %415 = vst [vmem:[#allocation3] sm:$0xff] (!%p1377_p5), %v1995_v19  ;;  %416 = vst [vmem:[#allocation3 + $0x8] sm:$0xff] (!%p1377_p5), %v1995_v19 }
  0x4a   : > { %417 = vst [vmem:[#allocation3 + $0x10] sm:$0xff] (!%p1377_p5), %v1995_v19  ;;  %418 = vst [vmem:[#allocation3 + $0x18] sm:$0xff] (!%p1377_p5), %v1995_v19 }
  0x4b   : > { %419 = vst [vmem:[#allocation3 + $0x20] sm:$0x1] (!%p1377_p5), %v1995_v19  ;;  %420 = vst [vmem:[#allocation3 + $0x28] sm:$0xff] (!%p1377_p5), %v1995_v19 }
  0x4c   : > { %421 = vst [vmem:[#allocation3 + $0x30] sm:$0xff] (!%p1377_p5), %v1995_v19  ;;  %422 = vst [vmem:[#allocation3 + $0x38] sm:$0xff] (!%p1377_p5), %v1995_v19 }
  0x4d   : > { %423 = vst [vmem:[#allocation3 + $0x40] sm:$0xff] (!%p1377_p5), %v1995_v19  ;;  %424 = vst [vmem:[#allocation3 + $0x48] sm:$0x1] (!%p1377_p5), %v1995_v19 }
  0x4e PF: > { %v2185_v20 = vld [vmem:[%s2568_s2] sm:$0xff]  ;;  %v2190_v21 = vld [vmem:[%s2568_s2 + $0x8] sm:$0xff]  ;;  %v2195_v22 = vld [vmem:[%s2568_s2 + $0x10] sm:$0xff]  ;;  %s2227_s9 = smov 0  }
  0x4f   : > { %v2200_v23 = vld [vmem:[%s2568_s2 + $0x18] sm:$0xff]  ;;  %v2205_v24 = vld [vmem:[%s2568_s2 + $0x20] sm:$0xff]  ;;  %v2210_v25 = vld [vmem:[%s2568_s2 + $0x28] sm:$0xff] }
  0x50   : > { %v2215_v26 = vld [vmem:[%s2568_s2 + $0x30] sm:$0xff]  ;;  %v2220_v27 = vld [vmem:[%s2568_s2 + $0x38] sm:$0xff]  ;;  %v2225_v28 = vld [vmem:[%s2568_s2 + $0x40] sm:$0x1] }
  0x51 LB: >> { %v1996_v29 = vmov 0.0|0.0   ;;  %vm1997_vm0 = vmmov 0   ;;  %v1998_v30 = vmov 0.0   ;;  %s440_s16 = smul.u32 40, %s1988_s9  ;;  %vm481_vm1 = vcmask 1040384   ;;  %s1378_s17 = sshll.u32 %s1988_s9, 5  ;;  %s1988_s9 = sphi %s2227_s9, %s439_s9  }
  0x52   : >> { %1612 = vmatprep.subr.bf16.mxu0 %v1996_v29  ;;  %1492 = vmatprep.mubr.msk.f32.mxu0 %vm1997_vm0, %v1998_v30  ;;  %vm453_vm2 = vcmask 269312   ;;  %s2589_s13 = scalar_lea.vmem [#allocation4], %s2174_s8  ;;  %vm627_vm3 = vcmask 261120   ;;  %s821_s7 = scalar_lea.vmem [#allocation2], %s1988_s9 }
  0x53   : >> { %s441_s19 = scalar_lea.vmem %s377_s12, %s440_s16 [#allocation5]  ;;  %s448_s11 = scalar_lea.vmem %s2589_s13, %s1378_s17 [#allocation4] }
  0x54   : >> { %v442_v31 = vld [vmem:[%s441_s19] sm:$0xff]  ;;  %v443_v32 = vld [vmem:[%s441_s19 + $0x8] sm:$0xff]  ;;  %v444_v33 = vld [vmem:[%s441_s19 + $0x10] sm:$0xff]  ;;  %s2357_s5 = scalar_lea.vmem [#allocation3], %s440_s16  ;;  %s439_s9 = sadd.s32 1, %s1988_s9  }
  0x55   : >> { %v1613_v34 = vpack.c.bf16 %v443_v32, %v442_v31  ;;  %v445_v35 = vld [vmem:[%s441_s19 + $0x18] sm:$0xff]  ;;  %v446_v37 = vld [vmem:[%s441_s19 + $0x20] sm:$0x1]  ;;  %v450_v39 = vld [vmem:[%s448_s11 + $0x8] sm:$0xff]  ;;  %p436_p6 = scmp.ge.s32.totalorder %s439_s9, 2  }
  0x56   : >> { %v1616_v36 = vpack.c.bf16 %v445_v35, %v444_v33  ;;  %v449_v38 = vld [vmem:[%s448_s11] sm:$0xff]  ;;  %v451_v41 = vld [vmem:[%s448_s11 + $0x10] sm:$0xff]  ;;  %v452_v42 = vld [vmem:[%s448_s11 + $0x18] sm:$0xff]  ;;  %p1405_p7 = scmp.ne.s32.totalorder (%p436_p6), %s1960_s23, 1 }
  0x57   : >> { %1614 = vmatpush3.bf16.msra.mxu0 %v1613_v34  ;;  %v1618_v40 = vpack.c.bf16 %v450_v39, %v449_v38  ;;  %v1622_v44 = vpack.c.bf16 %v452_v42, %v451_v41 }
  0x58   : >> { %1615 = vmatprep.subr.bf16.mxu0 %v1996_v29 }
  0x59   : >> { %1619 = vmatprep.subr.bf16.mxu1 %v1618_v40 }
  0x5a   : >> { %1621 = vmatpush3.bf16.msra.mxu1 %v1618_v40 }
  0x5b   : >> { %1617 = vmatpush3.bf16.msra.mxu0 %v1616_v36  ;;  %1623 = vmatprep.subr.bf16.mxu1 %v1622_v44 }
  0x5c   : >> { %1490 = vmatprep.subr.mxu0 %v1998_v30 }
  0x5e   : >> { %1625 = vmatpush3.bf16.msra.mxu1 %v1622_v44 }
  0x5f   : >> { %1491 = vmatpush3.msk.msra.mxu0 %vm481_vm1, %v446_v37  ;;  %1658 = vmatprep.subr.bf16.mxu1 %v1996_v29 }
  0x60   : >> { %1493 = vmatmul.mubr.msk.f32.vlgmr.msra.gmra.mrb[0].mxu0 %vm453_vm2, %v2185_v20  ;;  %1626 = vmatprep.subr.bf16.mxu0 %v1996_v29 }
  0x61   : >> { %1495 = vmatprep.mubr.msk.f32.mxu0 %vm1997_vm0, %v1998_v30 }
  0x64   : >> { %1496 = vmatmul.mubr.msk.f32.gmra.mrb[2].mxu0 %vm453_vm2, %v2190_v21 }
  0x65   : >> { %1498 = vmatprep.mubr.msk.f32.mxu0 %vm1997_vm0, %v1998_v30 }
  0x68   : >> { %1499 = vmatmul.mubr.msk.f32.gmra.mrb[4].mxu0 %vm453_vm2, %v2195_v22 }
  0x69   : >> { %1501 = vmatprep.mubr.msk.f32.mxu0 %vm1997_vm0, %v1998_v30 }
  0x6c   : >> { %1502 = vmatmul.mubr.msk.f32.gmra.mrb[6].mxu0 %vm453_vm2, %v2200_v23 }
  0x6d   : >> { %1504 = vmatprep.mubr.msk.f32.mxu0 %vm1997_vm0, %v1998_v30 }
  0x70   : >> { %1505 = vmatmul.mubr.msk.f32.gmra.mrb[8].mxu0 %vm453_vm2, %v2205_v24 }
  0x71   : >> { %1507 = vmatprep.mubr.msk.f32.mxu0 %vm1997_vm0, %v1998_v30 }
  0x74   : >> { %1508 = vmatmul.mubr.msk.f32.gmra.mrb[10].mxu0 %vm453_vm2, %v2210_v25 }
  0x75   : >> { %1510 = vmatprep.mubr.msk.f32.mxu0 %vm1997_vm0, %v1998_v30 }
  0x78   : >> { %1511 = vmatmul.mubr.msk.f32.gmra.mrb[12].mxu0 %vm453_vm2, %v2215_v26 }
  0x79   : >> { %1513 = vmatprep.mubr.msk.f32.mxu0 %vm1997_vm0, %v1998_v30 }
  0x7c   : >> { %1514 = vmatmul.mubr.msk.f32.gmra.mrb[14].mxu0 %vm453_vm2, %v2220_v27 }
  0x7d   : >> { %1516 = vmatprep.mubr.msk.f32.mxu0 %vm1997_vm0, %v1998_v30 }
  0x80   : >> { %1517 = vmatmul.mubr.msk.f32.gmra.mrb[16].mxu0 %vm453_vm2, %v2225_v28 }
  0x81   : >> { %1583 = vmatprep.mubr.msk.f32.mxu0 %vm1997_vm0, %v1998_v30 }
 0x133   : >> { %v551_v43 = vpop.f32.mrb[0].mxu0 }
 0x134   : >> { %595 = vxpose.xlu0.b32.start [1/4] (short) %v551_v43, 128  ;;  %v1494_v45 = vpop.f32.mrb[1].mxu0 }
 0x137   : >> { %v556_v46 = vpop.f32.mrb[2].mxu0 }
 0x138   : >> { %596 = vxpose.xlu0.b32.cont [2/4] (short) %v556_v46, 128  ;;  %v1497_v47 = vpop.f32.mrb[3].mxu0 }
 0x13b   : >> { %v561_v48 = vpop.f32.mrb[4].mxu0 }
 0x13c   : >> { %597 = vxpose.xlu0.b32.cont [3/4] (short) %v561_v48, 128  ;;  %v1500_v49 = vpop.f32.mrb[5].mxu0 }
 0x13f   : >> { %v566_v50 = vpop.f32.mrb[6].mxu0 }
 0x140   : >> { %598 = vxpose.xlu0.b32.end [4/4] (short) %v566_v50, 128  ;;  %v1503_v51 = vpop.f32.mrb[7].mxu0 }
 0x143   : >> { %v2301_v4 = vpop.f32.mrb[8].mxu0 }
 0x144   : >> { %v1506_v5 = vpop.f32.mrb[9].mxu0 }
 0x147   : >> { %v2303_v6 = vpop.f32.mrb[10].mxu0 }
 0x148   : >> { %v1509_v8 = vpop.f32.mrb[11].mxu0 }
 0x14b   : >> { %v2307_v10 = vpop.f32.mrb[12].mxu0 }
 0x14c   : >> { %v1512_v11 = vpop.f32.mrb[13].mxu0 }
 0x14f   : >> { %v2309_v12 = vpop.f32.mrb[14].mxu0 }
 0x150   : >> { %v1515_v13 = vpop.f32.mrb[15].mxu0 }
 0x153   : >> { %v2311_v16 = vpop.f32.mrb[16].mxu0 }
 0x154   : >> { %v1518_v17 = vpop.f32.mrb[17].mxu0 }
 0x1b4   : >> { %v611_v52 = vpop.trf.xlu0 }
 0x1b5   : >> { %1527 = vmatprep.mubr.msk.f32.mxu1 %vm627_vm3, %v611_v52 }
 0x1b8   : >> { %v612_v53 = vpop.trf.xlu0 }
 0x1b9   : >> { %1528 = vmatmul.mubr.msk.f32.vlgmr.msra.gmra.mrb[0].mxu1 %vm627_vm3, %v612_v53 }
 0x1bc   : >> { %v613_v54 = vpop.trf.xlu0 }
 0x1bd   : >> { %1530 = vmatprep.mubr.msk.f32.mxu1 %vm627_vm3, %v613_v54 }
 0x1c0   : >> { %v614_v55 = vpop.trf.xlu0 }
 0x1c1   : >> { %1531 = vmatmul.mubr.msk.f32.gmra.mrb[2].mxu1 %vm627_vm3, %v614_v55 }
 0x1c4   : >> { %v615_v56 = vpop.trf.xlu0 }
 0x1c5   : >> { %1533 = vmatprep.mubr.msk.f32.mxu1 %vm627_vm3, %v615_v56 }
 0x1c8   : >> { %v616_v57 = vpop.trf.xlu0 }
 0x1c9   : >> { %1534 = vmatmul.mubr.msk.f32.gmra.mrb[4].mxu1 %vm627_vm3, %v616_v57 }
 0x1cc   : >> { %v617_v58 = vpop.trf.xlu0 }
 0x1cd   : >> { %1536 = vmatprep.mubr.msk.f32.mxu1 %vm627_vm3, %v617_v58  ;;  %v849_v58 = vlaneseq }
 0x1d0   : >> { %v618_v59 = vpop.trf.xlu0 }
 0x1d1   : >> { %1537 = vmatmul.mubr.msk.f32.gmra.mrb[6].mxu1 %vm627_vm3, %v618_v59 }
 0x1d4   : >> { %v619_v60 = vpop.trf.xlu0 }
 0x1d5   : >> { %1539 = vmatprep.mubr.msk.f32.mxu1 %vm627_vm3, %v619_v60 }
 0x1d8   : >> { %v620_v61 = vpop.trf.xlu0 }
 0x1d9   : >> { %1540 = vmatmul.mubr.msk.f32.gmra.mrb[8].mxu1 %vm627_vm3, %v620_v61  ;;  %v850_v61 = vshrl.u32 %v849_v58, 7  ;;  %v907_v58 = vld [vmem:[%s2357_s5 + $0x20] sm:$0x1] }
 0x1dc   : >> { %v621_v62 = vpop.trf.xlu0 }
 0x1dd   : >> { %1542 = vmatprep.mubr.msk.f32.mxu1 %vm627_vm3, %v621_v62 }
 0x1e0   : >> { %v622_v63 = vpop.trf.xlu0 }
 0x1e1   : >> { %1543 = vmatmul.mubr.msk.f32.gmra.mrb[10].mxu1 %vm627_vm3, %v622_v63  ;;  %v822_v63 = vld [vmem:[%s821_s7] sm:$0x1] }
 0x1e4   : >> { %v623_v0 = vpop.trf.xlu0 }
 0x1e5   : >> { %1545 = vmatprep.mubr.msk.f32.mxu1 %vm627_vm3, %v623_v0 }
 0x1e8   : >> { %v624_v1 = vpop.trf.xlu0 }
 0x1e9   : >> { %1546 = vmatmul.mubr.msk.f32.gmra.mrb[12].mxu1 %vm627_vm3, %v624_v1  ;;  %v2342_v1 = vsub.s32 0, %v850_v61 }
 0x1ec   : >> { %v625_v2 = vpop.trf.xlu0 }
 0x1ed   : >> { %1548 = vmatprep.mubr.msk.f32.mxu1 %vm627_vm3, %v625_v2 }
 0x1f0   : >> { %v626_v3 = vpop.trf.xlu0 }
 0x1f1   : >> { %1549 = vmatmul.mubr.msk.f32.gmra.mrb[14].mxu1 %vm627_vm3, %v626_v3 }
 0x1f2   : >> { %1586 = vmatprep.mubr.msk.f32.mxu1 %vm1997_vm0, %v1998_v30 }
 0x28c   : >> { %v2305_v7 = vpop.f32.mrb[0].mxu1 }
 0x28d   : >> { %v742_v9 = vpop.f32.mrb[1].mxu1 }
 0x294   : >> { %v1532_v14 = vpop.f32.mrb[2].mxu1 }
 0x295   : >> { %v752_v15 = vpop.f32.mrb[3].mxu1 }
 0x29c   : >> { %v2313_v18 = vpop.f32.mrb[4].mxu1 }
 0x29d   : >> { %v824_v19 = vmax.f32 %v2305_v7, %v2313_v18  ;;  %v762_v31 = vpop.f32.mrb[5].mxu1 }
 0x29e   : >> { %v823_v32 = vmax.f32 %v742_v9, %v762_v31 }
 0x2a4   : >> { %v2317_v33 = vpop.f32.mrb[6].mxu1 }
 0x2a5   : >> { %v826_v34 = vmax.f32 %v1532_v14, %v2317_v33  ;;  %v772_v35 = vpop.f32.mrb[7].mxu1 }
 0x2a6   : >> { %v825_v36 = vmax.f32 %v752_v15, %v772_v35 }
 0x2ac   : >> { %v2320_v37 = vpop.f32.mrb[8].mxu1 }
 0x2ad   : >> { %v828_v38 = vmax.f32 %v824_v19, %v2320_v37  ;;  %v2323_v39 = vpop.f32.mrb[9].mxu1 }
 0x2ae   : >> { %v827_v40 = vmax.f32 %v823_v32, %v2323_v39 }
 0x2b4   : >> { %v2326_v41 = vpop.f32.mrb[10].mxu1 }
 0x2b5   : >> { %v830_v42 = vmax.f32 %v826_v34, %v2326_v41  ;;  %v2329_v43 = vpop.f32.mrb[11].mxu1 }
 0x2b6   : >> { %v829_v44 = vmax.f32 %v825_v36, %v2329_v43 }
 0x2bc   : >> { %v2332_v45 = vpop.f32.mrb[12].mxu1 }
 0x2bd   : >> { %v832_v46 = vmax.f32 %v828_v38, %v2332_v45  ;;  %v2335_v47 = vpop.f32.mrb[13].mxu1 }
 0x2be   : >> { %v831_v48 = vmax.f32 %v827_v40, %v2335_v47 }
 0x2c0   : >> { %v835_v49 = vmax.f32 %v831_v48, %v832_v46 }
 0x2c4   : >> { %v2338_v50 = vpop.f32.mrb[14].mxu1 }
 0x2c5   : >> { %v834_v51 = vmax.f32 %v830_v42, %v2338_v50  ;;  %v812_v52 = vpop.f32.mrb[15].mxu1 }
 0x2c6   : >> { %v833_v53 = vmax.f32 %v829_v44, %v812_v52 }
 0x2c8   : >> { %v836_v54 = vmax.f32 %v833_v53, %v834_v51 }
 0x2ca   : >> { %v837_v55 = vmax.f32 %v835_v49, %v836_v54 }
 0x2cc   : >> { %v838_v56 = vrot.slane %v837_v55, 4 }
 0x2ce   : >> { %v839_v57 = vmax.f32 %v837_v55, %v838_v56 }
 0x2d0   : >> { %v840_v59 = vrot.slane %v839_v57, 2 }
 0x2d2   : >> { %v841_v60 = vmax.f32 %v839_v57, %v840_v59  ;;  %v906_v57 = vld [vmem:[%s2357_s5 + $0x18] sm:$0xff] }
 0x2d4   : >> { %v842_v62 = vrot.slane %v841_v60, 1 }
 0x2d6   : >> { %v843_v0 = vmax.f32 %v841_v60, %v842_v62 }
 0x2d8   : >> { %v844_v2 = vmax.f32 %v822_v63, %v843_v0 }
 0x2da   : >> { %v845_v3 = vsub.f32 %v822_v63, %v844_v2  ;;  %v852_v5 = vrot.slane %v844_v2, %v2342_v1  ;;  %1019 = vst [vmem:[%s821_s7] sm:$0x1] %v844_v2 }
 0x2dc   : >> { %v846_v8 = vmul.f32 1.442695, %v845_v3  ;;  %v868_v11 = vsub.f32 %v812_v52, %v852_v5  ;;  %v854_v13 = vsub.f32 %v742_v9, %v852_v5  ;;  %v855_v17 = vsub.f32 %v2305_v7, %v852_v5 }
 0x2dd   : >> { %v856_v19 = vsub.f32 %v752_v15, %v852_v5  ;;  %v857_v32 = vsub.f32 %v1532_v14, %v852_v5  ;;  %v858_v34 = vsub.f32 %v762_v31, %v852_v5  ;;  %v859_v36 = vsub.f32 %v2313_v18, %v852_v5 }
 0x2de   : >> { %1810 = vpow2.f32 %v846_v8  ;;  %v898_v38 = vmul.f32 1.442695, %v868_v11  ;;  %v870_v40 = vmul.f32 1.442695, %v854_v13  ;;  %v872_v42 = vmul.f32 1.442695, %v855_v17 }
 0x2df   : >> { %v874_v44 = vmul.f32 1.442695, %v856_v19  ;;  %v860_v46 = vsub.f32 %v772_v35, %v852_v5  ;;  %v876_v48 = vmul.f32 1.442695, %v857_v32  ;;  %v861_v49 = vsub.f32 %v2317_v33, %v852_v5 }
 0x2e0   : >> { %1812 = vpow2.f32 %v898_v38  ;;  %v862_v51 = vsub.f32 %v2323_v39, %v852_v5  ;;  %v878_v9 = vmul.f32 1.442695, %v858_v34  ;;  %v863_v7 = vsub.f32 %v2320_v37, %v852_v5 }
 0x2e1   : >> { %1814 = vpow2.f32 %v870_v40  ;;  %v864_v14 = vsub.f32 %v2329_v43, %v852_v5  ;;  %v880_v15 = vmul.f32 1.442695, %v859_v36  ;;  %v865_v18 = vsub.f32 %v2326_v41, %v852_v5 }
 0x2e2   : >> { %1816 = vpow2.f32 %v872_v42  ;;  %v882_v31 = vmul.f32 1.442695, %v860_v46  ;;  %v866_v35 = vsub.f32 %v2335_v47, %v852_v5  ;;  %v884_v52 = vmul.f32 1.442695, %v861_v49  ;;  %v904_v47 = vld [vmem:[%s2357_s5 + $0x8] sm:$0xff] }
 0x2e3   : >> { %1818 = vpow2.f32 %v874_v44  ;;  %v867_v33 = vsub.f32 %v2332_v45, %v852_v5  ;;  %v869_v39 = vsub.f32 %v2338_v50, %v852_v5  ;;  %v886_v53 = vmul.f32 1.442695, %v862_v51  ;;  %v903_v45 = vld [vmem:[%s2357_s5] sm:$0xff]  ;;  %v905_v50 = vld [vmem:[%s2357_s5 + $0x10] sm:$0xff] }
 0x2e4   : >> { %1820 = vpow2.f32 %v876_v48  ;;  %v888_v37 = vmul.f32 1.442695, %v863_v7  ;;  %v890_v43 = vmul.f32 1.442695, %v864_v14  ;;  %v892_v41 = vmul.f32 1.442695, %v865_v18 }
 0x2e5   : >> { %1822 = vpow2.f32 %v878_v9  ;;  %v894_v55 = vmul.f32 1.442695, %v866_v35  ;;  %v896_v60 = vmul.f32 1.442695, %v867_v33  ;;  %v900_v61 = vmul.f32 1.442695, %v869_v39 }
 0x2e6   : >> { %1824 = vpow2.f32 %v880_v15 }
 0x2e7   : >> { %1826 = vpow2.f32 %v882_v31 }
 0x2e8   : >> { %v1811_v54 = vpop.eup %1810  ;;  %1828 = vpow2.f32 %v884_v52 }
 0x2e9   : >> { %1830 = vpow2.f32 %v886_v53  ;;  %v912_v56 = vrot.slane %v1811_v54, %v2342_v1 }
 0x2ea   : >> { %v1813_v59 = vpop.eup %1812  ;;  %1832 = vpow2.f32 %v888_v37 }
 0x2eb   : >> { %v1815_v62 = vpop.eup %1814  ;;  %1834 = vpow2.f32 %v890_v43  ;;  %v2365_v63 = vmul.f32 %v912_v56, %v903_v45  ;;  %v2367_v0 = vmul.f32 %v912_v56, %v904_v47  ;;  %v2369_v2 = vmul.f32 %v912_v56, %v905_v50 }
 0x2ec   : >> { %v1817_v3 = vpop.eup %1816  ;;  %1836 = vpow2.f32 %v892_v41  ;;  %v2371_v5 = vmul.f32 %v912_v56, %v906_v57  ;;  %v2373_v8 = vmul.f32 %v912_v56, %v907_v58 }
 0x2ed   : >> { %v1819_v11 = vpop.eup %1818  ;;  %v1627_v13 = vpack.c.bf16 %v1817_v3, %v1815_v62  ;;  %1838 = vpow2.f32 %v894_v55 }
 0x2ee   : >> { %v1821_v17 = vpop.eup %1820  ;;  %1840 = vpow2.f32 %v896_v60 }
 0x2ef   : >> { %v1823_v19 = vpop.eup %1822  ;;  %1628 = vmatpush3.bf16.msra.mxu0 %v1627_v13  ;;  %1666 = vmatpush3.bf16.msra.mxu1 %v1627_v13  ;;  %v1630_v32 = vpack.c.bf16 %v1821_v17, %v1819_v11  ;;  %1842 = vpow2.f32 %v900_v61 }
 0x2f0   : >> { %v1825_v34 = vpop.eup %1824  ;;  %1629 = vmatprep.subr.bf16.mxu0 %v1996_v29  ;;  %1659 = vmatprep.subr.bf16.mxu1 %v1996_v29 }
 0x2f1   : >> { %v1827_v36 = vpop.eup %1826  ;;  %v1633_v38 = vpack.c.bf16 %v1825_v34, %v1823_v19 }
 0x2f2   : >> { %v1829_v40 = vpop.eup %1828 }
 0x2f3   : >> { %v1831_v42 = vpop.eup %1830  ;;  %1631 = vmatpush3.bf16.msra.mxu0 %v1630_v32  ;;  %1667 = vmatpush3.bf16.msra.mxu1 %v1630_v32  ;;  %v1636_v44 = vpack.c.bf16 %v1829_v40, %v1827_v36 }
 0x2f4   : >> { %v1833_v46 = vpop.eup %1832  ;;  %1632 = vmatprep.subr.bf16.mxu0 %v1996_v29  ;;  %1660 = vmatprep.subr.bf16.mxu1 %v1996_v29 }
 0x2f5   : >> { %v1835_v48 = vpop.eup %1834  ;;  %v1639_v49 = vpack.c.bf16 %v1833_v46, %v1831_v42 }
 0x2f6   : >> { %v1837_v51 = vpop.eup %1836 }
 0x2f7   : >> { %v1839_v9 = vpop.eup %1838  ;;  %1634 = vmatpush3.bf16.msra.mxu0 %v1633_v38  ;;  %1668 = vmatpush3.bf16.msra.mxu1 %v1633_v38  ;;  %v1642_v7 = vpack.c.bf16 %v1837_v51, %v1835_v48 }
 0x2f8   : >> { %v1841_v14 = vpop.eup %1840  ;;  %1635 = vmatprep.subr.bf16.mxu0 %v1996_v29  ;;  %1661 = vmatprep.subr.bf16.mxu1 %v1996_v29 }
 0x2f9   : >> { %v1843_v15 = vpop.eup %1842  ;;  %v1645_v18 = vpack.c.bf16 %v1841_v14, %v1839_v9 }
 0x2fa   : >> { %v1648_v31 = vpack.c.bf16 %v1843_v15, %v1813_v59 }
 0x2fb   : >> { %1637 = vmatpush3.bf16.msra.mxu0 %v1636_v44  ;;  %1669 = vmatpush3.bf16.msra.mxu1 %v1636_v44 }
 0x2fc   : >> { %1638 = vmatprep.subr.bf16.mxu0 %v1996_v29  ;;  %1662 = vmatprep.subr.bf16.mxu1 %v1996_v29 }
 0x2ff   : >> { %1640 = vmatpush3.bf16.msra.mxu0 %v1639_v49  ;;  %1670 = vmatpush3.bf16.msra.mxu1 %v1639_v49 }
 0x300   : >> { %1641 = vmatprep.subr.bf16.mxu0 %v1996_v29  ;;  %1663 = vmatprep.subr.bf16.mxu1 %v1996_v29 }
 0x303   : >> { %1643 = vmatpush3.bf16.msra.mxu0 %v1642_v7  ;;  %1671 = vmatpush3.bf16.msra.mxu1 %v1642_v7 }
 0x304   : >> { %1644 = vmatprep.subr.bf16.mxu0 %v1996_v29  ;;  %1664 = vmatprep.subr.bf16.mxu1 %v1996_v29 }
 0x307   : >> { %1646 = vmatpush3.bf16.msra.mxu0 %v1645_v18  ;;  %1672 = vmatpush3.bf16.msra.mxu1 %v1645_v18 }
 0x308   : >> { %1647 = vmatprep.subr.bf16.mxu0 %v1996_v29  ;;  %1665 = vmatprep.subr.bf16.mxu1 %v1996_v29 }
 0x30b   : >> { %1649 = vmatpush3.bf16.msra.mxu0 %v1648_v31  ;;  %1673 = vmatpush3.bf16.msra.mxu1 %v1648_v31 }
 0x30e   : >> { %1584 = vmatmul.mubr.f32.vlgmr.msra.gmra.mrb[18].mxu0 %v2301_v4  ;;  %1587 = vmatmul.mubr.f32.vlgmr.msra.gmra.mrb[16].mxu1 %v2303_v6 }
 0x30f   : >> { %1589 = vmatprep.mubr.msk.f32.mxu1 %vm1997_vm0, %v1998_v30 }
 0x312   : >> { %1590 = vmatmul.mubr.f32.gmra.mrb[18].mxu1 %v2307_v10 }
 0x313   : >> { %1592 = vmatprep.mubr.msk.f32.mxu1 %vm1997_vm0, %v1998_v30 }
 0x316   : >> { %1593 = vmatmul.mubr.f32.gmra.mrb[20].mxu1 %v2309_v12 }
 0x317   : >> { %1595 = vmatprep.mubr.msk.f32.mxu1 %vm1997_vm0, %v1998_v30 }
 0x31a   : >> { %1596 = vmatmul.mubr.f32.gmra.mrb[22].mxu1 %v2311_v16 }
 0x3e1   : >> { %v985_v29 = vpop.f32.mrb[18].mxu0  ;;  %v990_v4 = vpop.f32.mrb[16].mxu1 }
 0x3e2   : >> { %v1009_v6 = vadd.f32 %v985_v29, %v2365_v63  ;;  %v1010_v35 = vadd.f32 %v990_v4, %v2367_v0  ;;  %v1585_v10 = vpop.f32.mrb[19].mxu0  ;;  %v1588_v52 = vpop.f32.mrb[17].mxu1 }
 0x3e4   : >> { %1014 = vst [vmem:[%s2357_s5] sm:$0xff] %v1009_v6  ;;  %1015 = vst [vmem:[%s2357_s5 + $0x8] sm:$0xff] %v1010_v35 }
 0x3e5   : >> { %v995_v33 = vpop.f32.mrb[18].mxu1 }
 0x3e6   : >> { %v1011_v12 = vadd.f32 %v995_v33, %v2369_v2  ;;  %v1591_v39 = vpop.f32.mrb[19].mxu1 }
 0x3e8   : >> { %1016 = vst [vmem:[%s2357_s5 + $0x10] sm:$0xff] %v1011_v12 }
 0x3e9   : >> { %v1000_v30 = vpop.f32.mrb[20].mxu1 }
 0x3ea   : >> { %v1012_v16 = vadd.f32 %v1000_v30, %v2371_v5  ;;  %v1594_v53 = vpop.f32.mrb[21].mxu1  ;;  %438 = sbr.rel (!%p436_p6) target bundleno = 81 (0x51), region = 193 }
 0x3ec   : >> { %1017 = vst [vmem:[%s2357_s5 + $0x18] sm:$0xff] %v1012_v16 }
 0x3ed   : >> { %v1005_v37 = vpop.f32.mrb[22].mxu1 }
 0x3ee   : >> { %v1013_v43 = vadd.f32 %v1005_v37, %v2373_v8  ;;  %v1597_v54 = vpop.f32.mrb[23].mxu1 }
 0x3f0   : >> { %1018 = vst [vmem:[%s2357_s5 + $0x20] sm:$0x1] %v1013_v43 }
 0x3f1   : > { %1023 = sbr.rel (%p1405_p7) target bundleno = 1384 (0x568), region = 131  ;;  %v2417_v41 = vld [vmem:[%s2569_s3] sm:$0xff] (!%p1405_p7)  ;;  %v2422_v45 = vld [vmem:[%s2569_s3 + $0x8] sm:$0xff] (!%p1405_p7)  ;;  %v2427_v47 = vld [vmem:[%s2569_s3 + $0x10] sm:$0xff] (!%p1405_p7)  ;;  %s2454_s19 = smov (!%p1405_p7), 0  }
 0x3f2   : > { %v2432_v20 = vld [vmem:[%s2569_s3 + $0x18] sm:$0xff] (!%p1405_p7)  ;;  %v2437_v21 = vld [vmem:[%s2570_s4] sm:$0xff] (!%p1405_p7)  ;;  %v2442_v22 = vld [vmem:[%s2570_s4 + $0x8] sm:$0xff] (!%p1405_p7) }
 0x3f3   : > { %v2447_v23 = vld [vmem:[%s2570_s4 + $0x10] sm:$0xff] (!%p1405_p7)  ;;  %v2452_v24 = vld [vmem:[%s2570_s4 + $0x18] sm:$0xff] (!%p1405_p7) }
 0x3f8 LB: >> { %1606 = vmatprep.mubr.msk.f32.mxu0 %vm627_vm3, %v2417_v41  ;;  %1609 = vmatprep.mubr.msk.f32.mxu1 %vm627_vm3, %v2427_v47  ;;  %v1999_v25 = vmov 0   ;;  %v2000_v26 = vmov 1   ;;  %s1044_s17 = smul.u32 40, %s1992_s19  ;;  %s1406_s9 = sshll.u32 %s1992_s19, 5  ;;  %s1992_s19 = sphi %s2454_s19, %s1037_s19  }
 0x3f9   : >> { %1845 = vset.pattern.permute.xlu1 %v1999_v25  ;;  %1844 = vset.pattern.permute.xlu0 %v1999_v25  ;;  %s2590_s11 = scalar_lea.vmem [#allocation4], %s2174_s8  ;;  %s2591_s18 = scalar_lea.vmem [#allocation6], %s2174_s8 }
 0x3fa   : >> { %1072 = vperm.xlu1 %1845, %v2447_v23   ;;  %1062 = vperm.xlu0 %1844, %v2437_v21   ;;  %s1045_s13 = scalar_lea.vmem [#allocation3], %s1044_s17  ;;  %s1039_s23 = scalar_lea.vmem %s2590_s11, %s1406_s9 [#allocation4] }
 0x3fb   : >> { %v1050_v27 = vld [vmem:[%s1045_s13 + $0x20] sm:$0x1]  ;;  %v1048_v55 = vld [vmem:[%s1045_s13 + $0x10] sm:$0xff]  ;;  %v1049_v57 = vld [vmem:[%s1045_s13 + $0x18] sm:$0xff]  ;;  %s1210_s12 = scalar_lea.vmem %s2591_s18, %s1406_s9 [#allocation6]  ;;  %s1037_s19 = sadd.s32 1, %s1992_s19  }
 0x3fc   : >> { %1848 = vrcp.f32 %v1050_v27  ;;  %v1046_v56 = vld [vmem:[%s1045_s13] sm:$0xff]  ;;  %v1047_v58 = vld [vmem:[%s1045_s13 + $0x8] sm:$0xff]  ;;  %v1042_v2 = vld [vmem:[%s1039_s23 + $0x10] sm:$0xff]  ;;  %p1034_p8 = scmp.ge.s32.totalorder %s1037_s19, 2  }
 0x3fd   : >> { %v1040_v8 = vld [vmem:[%s1039_s23] sm:$0xff]  ;;  %v1043_v13 = vld [vmem:[%s1039_s23 + $0x18] sm:$0xff]  ;;  %v1041_v19 = vld [vmem:[%s1039_s23 + $0x8] sm:$0xff] }
 0x3fe   : >> { %1077 = vperm.xlu1 %1845, %v2452_v24   ;;  %1067 = vperm.xlu0 %1844, %v2442_v22  }
 0x402   : >> { %1847 = vset.pattern.permute.xlu1 %v2000_v26  ;;  %1846 = vset.pattern.permute.xlu0 %v2000_v26 }
 0x403   : >> { %1093 = vperm.xlu1 %1847, %v2442_v22   ;;  %1089 = vperm.xlu0 %1846, %v2437_v21  }
 0x406   : >> { %v1849_v28 = vpop.eup %1848 }
 0x407   : >> { %1097 = vperm.xlu1 %1847, %v2447_v23   ;;  %1101 = vperm.xlu0 %1846, %v2452_v24   ;;  %v1055_v50 = vrot.slane %v1849_v28, %v2342_v1 }
 0x409   : >> { %v1058_v59 = vmul.f32 %v1055_v50, %v1048_v55  ;;  %v1056_v60 = vmul.f32 %v1055_v50, %v1046_v56  ;;  %v1059_v63 = vmul.f32 %v1055_v50, %v1049_v57  ;;  %v1057_v0 = vmul.f32 %v1055_v50, %v1047_v58 }
 0x479   : >> { %v1073_v61 = vpop.permute.xlu1 %1072  ;;  %v1063_v62 = vpop.permute.xlu0 %1062 }
 0x47a   : >> { %v1082_v3 = vadd.f32 %v1073_v61, %v1058_v59  ;;  %v1080_v5 = vadd.f32 %v1063_v62, %v1056_v60 }
 0x47c   : >> { %v1086_v36 = vsub.f32 %v1042_v2, %v1082_v3  ;;  %v1084_v38 = vsub.f32 %v1040_v8, %v1080_v5 }
 0x47d   : >> { %v1078_v11 = vpop.permute.xlu1 %1077  ;;  %v1068_v17 = vpop.permute.xlu0 %1067 }
 0x47e   : >> { %v1083_v32 = vadd.f32 %v1078_v11, %v1059_v63  ;;  %v1081_v34 = vadd.f32 %v1068_v17, %v1057_v0 }
 0x480   : >> { %v1087_v40 = vsub.f32 %v1043_v13, %v1083_v32  ;;  %v1085_v42 = vsub.f32 %v1041_v19, %v1081_v34 }
 0x482   : >> { %v1650_v44 = vpack.c.bf16 %v1085_v42, %v1084_v38  ;;  %v1654_v46 = vpack.c.bf16 %v1087_v40, %v1086_v36  ;;  %v1094_v48 = vpop.permute.xlu1 %1093  ;;  %v1090_v49 = vpop.permute.xlu0 %1089 }
 0x484   : >> { %1651 = vmatprep.subr.bf16.mxu0 %v1650_v44  ;;  %1674 = vmatprep.subr.bf16.mxu1 %v1650_v44 }
 0x485   : >> { %1653 = vmatpush3.bf16.msra.mxu0 %v1650_v44  ;;  %1676 = vmatpush3.bf16.msra.mxu1 %v1650_v44 }
 0x486   : >> { %1655 = vmatprep.subr.bf16.mxu0 %v1654_v46  ;;  %1675 = vmatprep.subr.bf16.mxu1 %v1654_v46  ;;  %v1098_v51 = vpop.permute.xlu1 %1097  ;;  %v1102_v9 = vpop.permute.xlu0 %1101 }
 0x489   : >> { %1657 = vmatpush3.bf16.msra.mxu0 %v1654_v46  ;;  %1677 = vmatpush3.bf16.msra.mxu1 %v1654_v46 }
 0x48c   : >> { %1607 = vmatmul.mubr.msk.f32.vlgmr.msra.gmra.mrb[0].mxu0 %vm627_vm3, %v2422_v45  ;;  %1610 = vmatmul.mubr.msk.f32.vlgmr.msra.gmra.mrb[0].mxu1 %vm627_vm3, %v2432_v20 }
 0x55f   : >> { %v1608_v7 = vpop.f32.mrb[0].mxu0  ;;  %v1611_v14 = vpop.f32.mrb[0].mxu1 }
 0x560   : >> { %v1189_v15 = vadd.f32 %v1608_v7, %v1094_v48  ;;  %v1199_v18 = vadd.f32 %v1611_v14, %v1102_v9  ;;  %v1183_v31 = vpop.f32.mrb[1].mxu0  ;;  %v1193_v29 = vpop.f32.mrb[1].mxu1 }
 0x561   : >> { %v1184_v4 = vadd.f32 %v1183_v31, %v1090_v49  ;;  %v1194_v6 = vadd.f32 %v1193_v29, %v1098_v51  ;;  %1036 = sbr.rel (!%p1034_p8) target bundleno = 1016 (0x3f8), region = 204 }
 0x562   : >> { %v1203_v35 = vmax.f32 %v1189_v15, 0.0  ;;  %v1205_v10 = vmax.f32 %v1199_v18, 0.0 }
 0x563   : >> { %v1202_v52 = vmax.f32 %v1184_v4, 0.0  ;;  %v1204_v33 = vmax.f32 %v1194_v6, 0.0 }
 0x564   : >> { %v1207_v12 = vadd.f32 %v1203_v35, %v1041_v19  ;;  %v1209_v39 = vadd.f32 %v1205_v10, %v1043_v13 }
 0x565   : >> { %v1206_v30 = vadd.f32 %v1202_v52, %v1040_v8  ;;  %v1208_v16 = vadd.f32 %v1204_v33, %v1042_v2 }
 0x566   : >> { %1212 = vst [vmem:[%s1210_s12 + $0x8] sm:$0xff] %v1207_v12  ;;  %1214 = vst [vmem:[%s1210_s12 + $0x18] sm:$0xff] %v1209_v39 }
 0x567   : >> { %1211 = vst [vmem:[%s1210_s12] sm:$0xff] %v1206_v30  ;;  %1213 = vst [vmem:[%s1210_s12 + $0x10] sm:$0xff] %v1208_v16 }
 0x568 PF: > { %s1418_s7 = sshll.u32 %s1968_s25, 4  ;;  %s2592_s14 = scalar_lea.vmem [#allocation6], %s2174_s8 }
 0x569   : > { %s1228_s5 = sadd.s32 %s1964_s24, %s1418_s7  ;;  %s1231_s10 = sshll.u32 %s2592_s14, 4  ;;  %s2493_s10 = int_to_ptr.vmem [resolvable:$true] %s1231_s10 }
 0x56a   : > { %s1414_s16 = sshll.u32 %s1228_s5, 7  ;;  %s2593_s9 = sld [smem:[#allocation14_spill]] }
 0x56b   : > { %s2594_s11 = sand.u32 1, %s1952_s21   ;;  %s1850_s18 = scalar_lea.vmem %s2493_s10, 1024 }
 0x56c   : > { %s2502_s23 = scalar_lea.sflag [#allocation7], %s2594_s11  ;;  %p1851_p9 = scmp.ne.s32.totalorder %s2493_s10, %s1850_s18 }
 0x56d   : > { %s2001_s24 = smov [#allocation6]  }
 0x56e   : > { %p1852_p10 = pnand %p1851_p9, %p2134_p11  ;;  %s1854_s25 = sshll.u32 %s2001_s24, 4  ;;  %s1855_s25 = int_to_ptr.vmem [resolvable:$false] %s1854_s25 }
 0x56f   : > { %s1856_s8 = scalar_lea.vmem %s1855_s25, 2048  ;;  %p1857_p0 = scmp.lt.s32.totalorder %s2493_s10, %s1855_s25 }
 0x570   : > { %s2498_s19 = scalar_lea.hbm %s2593_s9, %s1414_s16  ;;  %p1853_p13 = pneg %p1852_p10 }
 0x571   : > { %p1858_p2 = scmp.lt.s32.totalorder %s1856_s8, %s1850_s18 }
 0x573   : > { %p1859_p1 = por %p1858_p2, %p1857_p0 }
 0x575   : > { %p1860_p3 = pnand %p1859_p1, %p1853_p13 }
 0x577   : > { %1863 = shalt.err (!%p1860_p3)
}
 0x578   : > { %s1864_s12 = scalar_lea.hbm %s2498_s19, 1024  ;;  %s1868_s14 = scalar_lea.hbm %s2593_s9, 4096 }
 0x579   : > { %p1865_p4 = scmp.ne.s32.totalorder %s2498_s19, %s1864_s12  ;;  %p1869_p7 = scmp.lt.u32.totalorder %s2498_s19, %s2593_s9 }
 0x57a   : > { %p1870_p8 = scmp.lt.u32.totalorder %s1868_s14, %s1864_s12  ;;  %p1872_p10 = scmp.lt.u32.totalorder %s1864_s12, %s2498_s19 }
 0x57b   : > { %p1866_p5 = pnand %p1865_p4, %p2134_p11 }
 0x57c   : > { %p1871_p9 = por %p1870_p8, %p1869_p7 }
 0x57d   : > { %p1867_p6 = pneg %p1866_p5 }
 0x57e   : > { %p1873_p13 = por %p1872_p10, %p1871_p9 }
 0x580   : > { %p1874_p0 = pnand %p1873_p13, %p1867_p6 }
 0x582   : > { %1877 = shalt.err (!%p1874_p0)
}
 0x583   : > { %s2002_s13 = smov 128   ;;  %s2003_s11 = smov 256  }
 0x584   : > { %s2004_s18 = smov 8  }
 0x585   : > { %1681 = dma.vmem_to_hbm [thread:$0]  (%p2134_p11), %s2493_s10, 1024, %s2498_s19, %s2502_s23, %s2002_s13, %s2003_s11, %s2004_s18  }
 0x586 PF: > { %s2595_s24 = sld [smem:[#allocation9_spill]]  ;;  %p1687_p2 = scmp.ge.s32.totalorder %s1984_s29, 2 }
 0x588   : > { %p1684_p1 = pnand %p1687_p2, %p2138_p12 }
 0x58c   : > { %s1246_s8 = sand.u32 1, %s2595_s24  }
 0x58d   : > { %s1247_s12 = scalar_lea.sflag [#allocation7], %s1246_s8 }
 0x58e   : > { %1935 = dma.done.wait (!%p1684_p1), %s1247_s12, 1024  }
 0x58f   : > { %1937 = vsyncadd (!%p1684_p1), %s1247_s12, 4294966272  ;;  %s18_s29 = sadd.s32 1, %s1984_s29   ;;  %s2597_s15 = sld [smem:[#allocation10_spill]] }
 0x590   : > { %p15_p3 = scmp.ge.s32.totalorder %s18_s29, 10   ;;  %s2598_s10 = sld [smem:[#allocation11_spill]] }
 0x591   : > { %s2599_s7 = sld [smem:[#allocation12_spill]]  ;;  %s2600_s18 = smov %s1952_s21 }
 0x592   : > { %s2601_s19 = smov %s1948_s20  ;;  %s2602_s20 = smov %s2149_s6 }
 0x593   : > { %s2603_s21 = smov %s1956_s22  ;;  %s2604_s22 = smov %s2146_s30 }
 0x594   : > { %s2605_s23 = smov %s1972_s26  ;;  %s2606_s24 = smov %s1976_s27 }
 0x595   : > { %s2607_s25 = smov %s1980_s28  ;;  %s2608_s26 = smov %s2597_s15 }
 0x596   : > { %s2609_s27 = smov %s2598_s10  ;;  %17 = sbr.rel (!%p15_p3) target bundleno = 9 (0x9), region = 215 }
 0x597   : > { %s2610_s28 = smov %s2599_s7 }
 0x59d   :  { %1252 = vsyncpa [#allocation7], 1 }
 0x59e   :  { %1254 = vsyncpa [#allocation7 + $0x1], 1 }

</bundles_post_ra>
